<compile_context>
chip_gen: v7x
topology: tpu7x:2x2x1
jax: 0.10.0
libtpu: 0.0.40
codegen_flags: <defaults>
</compile_context>

<pallas_src>
import functools

import jax
import jax.numpy as jnp
from jax.experimental import pallas as pl
from jax.experimental.pallas import tpu as pltpu


# ----------------------------------------------------------------------------- kernels
def _odefunc_kernel_resident_x(adj_ref, x_ref, e_ref, o_ref, acc_ref, *, tk):
    """K-tiled matmul with the full (padded) ODE state x resident in VMEM.

    adj_ref: (tm, tk)      bf16   row/K tile of the adjacency
    x_ref:   (Nk, d_pad)   bf16   FULL padded state (constant index_map -> fetched once)
    e_ref:   (tm, d_pad)   f32    row tile of the static embedding e
    o_ref:   (tm, d_pad)          row tile of the output
    acc_ref: (tm, d_pad)   f32    VMEM accumulator (persists across the K axis)
    """
    k = pl.program_id(1)

    @pl.when(k == 0)
    def _init():
        # Fold the "+ e" directly into the accumulator init (no epilogue add).
        acc_ref[...] = e_ref[...].astype(jnp.float32)

    start = pl.multiple_of(k * tk, 128)
    acc_ref[...] += jnp.dot(
        adj_ref[...], x_ref[pl.ds(start, tk), :], preferred_element_type=jnp.float32
    )

    @pl.when(k == pl.num_programs(1) - 1)
    def _store():
        o_ref[...] = acc_ref[...].astype(o_ref.dtype)


def _odefunc_kernel_tiled_x(adj_ref, x_ref, e_ref, o_ref, acc_ref):
    """Fallback for very large graphs: x streamed in (tk, d_pad) K-tiles."""
    k = pl.program_id(1)

    @pl.when(k == 0)
    def _init():
        acc_ref[...] = e_ref[...].astype(jnp.float32)

    acc_ref[...] += jnp.dot(
        adj_ref[...], x_ref[...], preferred_element_type=jnp.float32
    )

    @pl.when(k == pl.num_programs(1) - 1)
    def _store():
        o_ref[...] = acc_ref[...].astype(o_ref.dtype)


# ----------------------------------------------------------------------------- helpers
def _round_up(x, m):
    return (x + m - 1) // m * m


def _pad_cast(arr, shape, dtype):
    """Zero-pad `arr` up to `shape` and cast to `dtype` (no copy if already there)."""
    arr = arr.astype(dtype)
    if arr.shape == shape:
        return arr
    out = jnp.zeros(shape, dtype)
    return out.at[: arr.shape[0], : arr.shape[1]].set(arr)


def _vmem_limit_bytes():
    """Per-generation scoped VMEM budget with headroom (v7x: ~48 MiB, v5e/v6e: ~96 MiB)."""
    try:
        cap = int(pltpu.get_tpu_info().vmem_capacity_bytes)
    except Exception:
        cap = 64 * 1024 * 1024  # conservative (v7x has the smallest VMEM)
    return min(int(0.75 * cap), 100 * 1024 * 1024)


# ----------------------------------------------------------------------------- pallas_call wrapper
@functools.partial(
    jax.jit,
    static_argnames=("n_valid", "d_valid", "tm", "tk", "force_tiled_x"),
)
def ode_func_forward(adj_p, x, e_p, *, n_valid, d_valid, tm, tk, force_tiled_x=False):
    """f = adj @ x + e.  adj_p and e_p are PRE-padded/cast (static across calls);
    only the dynamic state x is cast+padded here (N*D bytes, negligible vs N^2)."""
    nr_pad, nk_pad = adj_p.shape
    d_pad = e_p.shape[1]
    N, D = x.shape
    assert N == n_valid and D == d_valid
    assert e_p.shape == (nr_pad, d_pad)
    assert nr_pad % tm == 0 and nk_pad % tk == 0
    assert tm % 128 == 0 and tk % 128 == 0 and d_pad % 128 == 0

    out_dtype = x.dtype
    x_p = _pad_cast(x, (nk_pad, d_pad), jnp.bfloat16)

    grid = (nr_pad // tm, nk_pad // tk)
    vmem_limit = _vmem_limit_bytes()

    # VMEM footprint bookkeeping (BlockSpec double-buffers each operand).
    adj_bytes = 2 * tm * tk * adj_p.dtype.itemsize
    e_bytes = 2 * tm * d_pad * 4
    out_bytes = 2 * tm * d_pad * jnp.dtype(out_dtype).itemsize
    acc_bytes = tm * d_pad * 4
    x_res_bytes = 2 * nk_pad * d_pad * 2  # resident x (fetched once; 2 bufs allocated)
    fixed_bytes = adj_bytes + e_bytes + out_bytes + acc_bytes

    use_resident_x = (not force_tiled_x) and (
        fixed_bytes + x_res_bytes <= int(0.9 * vmem_limit)
    )

    if use_resident_x:
        # Constant block index -> x is DMA'd into VMEM exactly once, not once per
        # row block (removes up to ~1/3 of total HBM bytes at small tm).
        kernel = functools.partial(_odefunc_kernel_resident_x, tk=tk)
        x_spec = pl.BlockSpec((nk_pad, d_pad), lambda i, k: (0, 0))
    else:
        kernel = _odefunc_kernel_tiled_x
        x_spec = pl.BlockSpec((tk, d_pad), lambda i, k: (k, 0))

    out = pl.pallas_call(
        kernel,
        out_shape=jax.ShapeDtypeStruct((nr_pad, d_pad), out_dtype),
        grid_spec=pltpu.PrefetchScalarGridSpec(
            num_scalar_prefetch=0,
            grid=grid,
            in_specs=[
                pl.BlockSpec((tm, tk), lambda i, k: (i, k)),      # adj tile
                x_spec,                                           # x (resident or K-tile)
                pl.BlockSpec((tm, d_pad), lambda i, k: (i, 0)),   # e row tile
            ],
            out_specs=pl.BlockSpec((tm, d_pad), lambda i, k: (i, 0)),
            scratch_shapes=[pltpu.VMEM((tm, d_pad), jnp.float32)],
        ),
        compiler_params=pltpu.CompilerParams(
            # Row axis is embarrassingly parallel (megacore split on v7x); the K
            # axis carries the accumulator so it must be "arbitrary".
            dimension_semantics=("parallel", "arbitrary"),
            vmem_limit_bytes=vmem_limit,
        ),
        cost_estimate=pl.CostEstimate(
            flops=2 * nr_pad * nk_pad * d_pad,
            transcendentals=0,
            bytes_accessed=(
                nr_pad * nk_pad * adj_p.dtype.itemsize   # adjacency read (dominant)
                + nk_pad * d_pad * 2                      # x read (bf16)
                + nr_pad * d_pad * 4                      # e read (f32)
                + nr_pad * d_pad * jnp.dtype(out_dtype).itemsize
            ),
        ),
    )(adj_p, x_p, e_p)

    if (nr_pad, d_pad) != (N, D):
        out = out[:N, :D]
    return out


# ----------------------------------------------------------------------------- module equivalent
class ODEFuncPallas:
    """JAX/Pallas equivalent of LightGODE's ODEFunc.

    The static adjacency is padded + cast to bf16 exactly once at construction
    (it does not depend on t), and the static embedding e is padded once in
    update_e, so the per-call forward only touches the dynamic state x.
    """

    def __init__(self, num_user, num_item, adj, *, tm=512, tk=2048, k_hops=1):
        self.num_user = num_user
        self.num_item = num_item
        n = num_user + num_item
        assert adj.shape == (n, n)
        self.n = n

        n128 = _round_up(n, 128)
        self.tm = min(tm, n128)
        self.tk = min(tk, n128)
        assert self.tm % 128 == 0 and self.tk % 128 == 0

        self.nr_pad = _round_up(n, self.tm)
        self.nk_pad = _round_up(n, self.tk)

        # Hoisted (done once): bf16 adjacency halves the dominant HBM read;
        # zero pad contributes 0 to the dot and is sliced off the output.
        self.adj_p = _pad_cast(adj, (self.nr_pad, self.nk_pad), jnp.bfloat16)

        self.e_p = None
        self.D = None

    def update_e(self, emb):
        N, D = emb.shape
        assert N == self.n
        self.D = D
        d_pad = _round_up(D, 128)
        # Hoisted (done once): e is static across RHS evaluations.
        self.e_p = _pad_cast(emb, (self.nr_pad, d_pad), jnp.float32)

    def forward(self, t, x, *, force_tiled_x=False):
        del t  # the RHS does not depend on t
        assert self.e_p is not None, "call update_e(emb) first"
        return ode_func_forward(
            self.adj_p,
            x,
            self.e_p,
            n_valid=self.n,
            d_valid=self.D,
            tm=self.tm,
            tk=self.tk,
            force_tiled_x=force_tiled_x,
        )

    __call__ = forward


# ----------------------------------------------------------------------------- demo / test
def make_normalized_adj(key, num_user, num_item):
    """Deterministic synthetic bipartite user-item graph, symmetrically normalized."""
    n = num_user + num_item
    r = jax.random.uniform(key, (num_user, num_item))
    inter = (r < 0.3).astype(jnp.float32)
    adj = jnp.zeros((n, n), dtype=jnp.float32)
    adj = adj.at[:num_user, num_user:].set(inter)
    adj = adj.at[num_user:, :num_user].set(inter.T)
    deg = jnp.sum(adj, axis=1)
    d_inv_sqrt = jnp.where(deg > 0, 1.0 / jnp.sqrt(jnp.maximum(deg, 1e-12)), 0.0)
    adj = adj * d_inv_sqrt[:, None] * d_inv_sqrt[None, :]
    return adj


if __name__ == "__main__":
    # Small shapes consistent with the module: N = num_user + num_item nodes,
    # D-dim embeddings. tm=tk=128 so the demo exercises a 2x2 (rows x K) grid,
    # including accumulator init/finalize and the resident-x K-slicing.
    num_user, num_item, D = 128, 128, 128
    N = num_user + num_item

    key = jax.random.PRNGKey(0)
    k_adj, k_x, k_e = jax.random.split(key, 3)

    adj = make_normalized_adj(k_adj, num_user, num_item)      # self.g (dense stand-in)
    x = jax.random.normal(k_x, (N, D), dtype=jnp.float32)     # ODE state
    e = jax.random.normal(k_e, (N, D), dtype=jnp.float32)     # self.e (set via update_e)

    func = ODEFuncPallas(num_user, num_item, adj, tm=128, tk=128)
    func.update_e(e)

    out = jax.block_until_ready(func.forward(0.0, x))                      # resident-x path
    out_tiled = jax.block_until_ready(func.forward(0.0, x, force_tiled_x=True))  # streamed fallback

    # Reference check (torch.spmm(g, x) + e semantics). bf16 adjacency/state
    # loosens tolerance vs the pure-f32 reference.
    ref = adj @ x + e
    assert out.shape == ref.shape
    assert jnp.allclose(out, ref, atol=1e-2, rtol=1e-2), "resident-x path mismatch"
    assert jnp.allclose(out_tiled, ref, atol=1e-2, rtol=1e-2), "tiled-x path mismatch"

    print("KERNEL_OK")
</pallas_src>

<mosaic_0001>
module attributes {stable_mosaic.version = 11 : i64} {
  func.func @_odefunc_kernel_resident_x(%arg0: i32, %arg1: i32, %arg2: memref<128x128xbf16, #tpu.memory_space<vmem>>, %arg3: memref<256x128xbf16, #tpu.memory_space<vmem>>, %arg4: memref<128x128xf32, #tpu.memory_space<vmem>>, %arg5: memref<128x128xf32, #tpu.memory_space<vmem>>, %arg6: memref<128x128xf32, #tpu.memory_space<vmem>>) attributes {dimension_semantics = [#tpu.dimension_semantics<parallel>, #tpu.dimension_semantics<arbitrary>], iteration_bounds = array<i64: 2, 2>, scalar_prefetch = 0 : i64, scratch_operands = 1 : i64, tpu.core_type = #tpu.core_type<tc>, window_params = [{transform_indices = @transform_0, window_bounds = array<i64: 128, 128>}, {pipeline_mode = #tpu.pipeline_mode<synchronous>, transform_indices = @transform_1, window_bounds = array<i64: 256, 128>}, {transform_indices = @transform_2, window_bounds = array<i64: 128, 128>}, {transform_indices = @transform_3, window_bounds = array<i64: 128, 128>}]} {
    %c0_i32 = arith.constant 0 : i32
    %0 = arith.cmpi eq, %arg1, %c0_i32 : i32
    %1 = arith.extui %0 : i1 to i32
    %c0_i32_0 = arith.constant 0 : i32
    %2 = arith.cmpi ne, %1, %c0_i32_0 : i32
    scf.if %2 {
      %c0_8 = arith.constant 0 : index
      %c0_9 = arith.constant 0 : index
      %15 = vector.load %arg4[%c0_8, %c0_9] : memref<128x128xf32, #tpu.memory_space<vmem>>, vector<128x128xf32>
      %c0_10 = arith.constant 0 : index
      %c0_11 = arith.constant 0 : index
      %16 = vector.load %arg6[%c0_10, %c0_11] : memref<128x128xf32, #tpu.memory_space<vmem>>, vector<128x128xf32>
      tpu.vector_store %arg6[%c0_10, %c0_11], %15 {strides = array<i32>} : memref<128x128xf32, #tpu.memory_space<vmem>>, vector<128x128xf32>,
    } else {
    }
    %c128_i32 = arith.constant 128 : i32
    %3 = arith.muli %arg1, %c128_i32 : i32
    %4 = tpu.assume_multiple %3, 128 : i32
    %c0 = arith.constant 0 : index
    %c0_1 = arith.constant 0 : index
    %5 = vector.load %arg6[%c0, %c0_1] : memref<128x128xf32, #tpu.memory_space<vmem>>, vector<128x128xf32>
    %c0_2 = arith.constant 0 : index
    %c0_3 = arith.constant 0 : index
    %6 = vector.load %arg2[%c0_2, %c0_3] : memref<128x128xbf16, #tpu.memory_space<vmem>>, vector<128x128xbf16>
    %7 = arith.index_cast %4 : i32 to index
    %c0_4 = arith.constant 0 : index
    %8 = vector.load %arg3[%7, %c0_4] : memref<256x128xbf16, #tpu.memory_space<vmem>>, vector<128x128xbf16>
    %cst = arith.constant dense<0.000000e+00> : vector<128x128xf32>
    %9 = tpu.matmul %6, %8, %cst {dimension_numbers = #tpu.dot_dimension_numbers<[1], [0], [0], [1], [0, 0, 1, 1], [], []>} : vector<128x128xbf16>, vector<128x128xbf16>, vector<128x128xf32> -> vector<128x128xf32>
    %10 = arith.addf %5, %9 : vector<128x128xf32>
    %c0_5 = arith.constant 0 : index
    %c0_6 = arith.constant 0 : index
    %11 = vector.load %arg6[%c0_5, %c0_6] : memref<128x128xf32, #tpu.memory_space<vmem>>, vector<128x128xf32>
    tpu.vector_store %arg6[%c0_5, %c0_6], %10 {strides = array<i32>} : memref<128x128xf32, #tpu.memory_space<vmem>>, vector<128x128xf32>,
    %c1_i32 = arith.constant 1 : i32
    %12 = arith.cmpi eq, %arg1, %c1_i32 : i32
    %13 = arith.extui %12 : i1 to i32
    %c0_i32_7 = arith.constant 0 : i32
    %14 = arith.cmpi ne, %13, %c0_i32_7 : i32
    scf.if %14 {
      %c0_8 = arith.constant 0 : index
      %c0_9 = arith.constant 0 : index
      %15 = vector.load %arg6[%c0_8, %c0_9] : memref<128x128xf32, #tpu.memory_space<vmem>>, vector<128x128xf32>
      %c0_10 = arith.constant 0 : index
      %c0_11 = arith.constant 0 : index
      %16 = vector.load %arg5[%c0_10, %c0_11] : memref<128x128xf32, #tpu.memory_space<vmem>>, vector<128x128xf32>
      tpu.vector_store %arg5[%c0_10, %c0_11], %15 {strides = array<i32>} : memref<128x128xf32, #tpu.memory_space<vmem>>, vector<128x128xf32>,
    } else {
    }
    return
  }
  func.func @transform_0(%arg0: i32, %arg1: i32) -> (i32, i32) {
    %c0_i32 = arith.constant 0 : i32
    return %arg0, %arg1 : i32, i32
  }
  func.func @transform_1(%arg0: i32, %arg1: i32) -> (i32, i32) {
    %c0_i32 = arith.constant 0 : i32
    %c0_i32_0 = arith.constant 0 : i32
    %c0_i32_1 = arith.constant 0 : i32
    return %c0_i32, %c0_i32_0 : i32, i32
  }
  func.func @transform_2(%arg0: i32, %arg1: i32) -> (i32, i32) {
    %c0_i32 = arith.constant 0 : i32
    %c0_i32_0 = arith.constant 0 : i32
    return %arg0, %c0_i32 : i32, i32
  }
  func.func @transform_3(%arg0: i32, %arg1: i32) -> (i32, i32) {
    %c0_i32 = arith.constant 0 : i32
    %c0_i32_0 = arith.constant 0 : i32
    return %arg0, %c0_i32 : i32, i32
  }
}

</mosaic_0001>

<bundles_post_ra>
// kernel: ode_func_forward.1
= control target key start
LH: loop header
LB: loop body
LE: loop exit
PB: predicated region body
PF: predicated region fallthrough
CT: control target
= control target key end

     0   :  { %s1498_s0 = inlined_call_operand.vmem [shape: bf16[256,256], index: 0, kind: input, shape index: {}]   ;;  %s1499_s1 = inlined_call_operand.vmem [shape: bf16[256,128], index: 1, kind: input, shape index: {}]   ;;  %s1500_s2 = inlined_call_operand.hbm [shape: f32[256,128], index: 2, kind: input, shape index: {}]   ;;  %s1501_s3 = inlined_call_operand.hbm [shape: f32[256,128], index: 3, kind: output, shape index: {}]  }
   0x1   :  { %1505 = sst [smem:[#allocation12_spill]] %s1498_s0 }
   0x2   :  { %8 = vsyncpa [#allocation5], 0 }
   0x3   :  { %10 = vsyncpa [#allocation5 + $0x1], 0 }
   0x4   :  { %11 = vsyncpa [#allocation6], 0 }
   0x5   :  { %13 = vsyncpa [#allocation6 + $0x1], 0  ;;  %s1187_s12 = smov 0   ;;  %s1189_s13 = smov 0  }
   0x6   :  { %s1191_s14 = smov 0   ;;  %s1193_s15 = smov 0  }
   0x7   :  { %s1195_s16 = smov 0   ;;  %s1197_s17 = smov 0  }
   0x8   :  { %s1199_s18 = smov 0   ;;  %s1201_s19 = smov 0  }
   0x9   :  { %s1203_s20 = smov 0   ;;  %s1205_s21 = smov 0  }
   0xa LB: > { %s801_s22 = sadd.s32 4294967295, %s1159_s21   ;;  %s802_s23 = sadd.s32 4294967294, %s1159_s21   ;;  %s1159_s21 = sphi %s1205_s21, %s19_s21   ;;  %s1155_s20 = sphi %s1203_s20, %s1526_s20   ;;  %s1151_s19 = sphi %s1201_s19, %s1525_s19   ;;  %s1147_s18 = sphi %s1199_s18, %s1524_s18   ;;  %s1143_s17 = sphi %s1197_s17, %s1523_s17   ;;  %s1139_s16 = sphi %s1195_s16, %s1522_s16   ;;  %s1135_s15 = sphi %s1193_s15, %s1521_s15   ;;  %s1131_s14 = sphi %s1191_s14, %s1520_s14   ;;  %s1127_s13 = sphi %s1189_s13, %s1519_s13   ;;  %s1123_s12 = sphi %s1187_s12, %s1518_s12  }
   0xb   : > { %s28_s24 = sadd.s32 1, %s1151_s19  ;;  %s31_s25 = sadd.s32 1, %s1155_s20 }
   0xc   : > { %p29_p0 = scmp.ge.s32.totalorder %s28_s24, 2  ;;  %s40_s26 = sadd.s32 1, %s1139_s16 }
   0xd   : > { %p47_p1 = scmp.ne.s32.totalorder %s1139_s16, %s1135_s15  ;;  %p48_p2 = scmp.eq.s32.totalorder %s1159_s21, 0 }
   0xe   : > { %s1528_s24 = smov (%p29_p0, %s28_s24), 0  ;;  %s1530_s25 = smov (!%p29_p0, %s31_s25), %s1155_s20 }
   0xf   : > { %1506 = sst [smem:[#allocation10_spill]] %s1528_s24  ;;  %s36_s27 = ssub.s32 %s1151_s19, %s1528_s24 }
  0x10   : > { %p1250_p3 = por %p48_p2, %p47_p1  ;;  %p33_p4 = scmp.ge.s32.totalorder %s1530_s25, 2 }
  0x11   : > { %s87_s29 = sadd.s32 1, %s1131_s14  ;;  %p94_p5 = scmp.ne.s32.totalorder %s1131_s14, %s1127_s13 }
  0x12   : > { %p100_p6 = scmp.ne.s32.totalorder %s1127_s13, %s1123_s12  ;;  %s1532_s25 = smov (%p33_p4, %s1530_s25), 0 }
  0x13   : > { %1508 = sst [smem:[#allocation11_spill]] %s1532_s25  ;;  %p1264_p7 = por %p94_p5, %p48_p2 }
  0x14   : > { %p101_p8 = scmp.eq.s32.totalorder %s801_s22, 0  ;;  %s35_s4 = ssub.s32 %s1155_s20, %s1532_s25 }
  0x15   : > { %p124_p9 = scmp.eq.s32.totalorder %s801_s22, 3  ;;  %s37_s5 = sor.u32 %s36_s27, %s35_s4 }
  0x16   : > { %p85_p10 = scmp.eq.s32.totalorder %s35_s4, 0  ;;  %p38_p11 = scmp.eq.s32.totalorder %s37_s5, 0 }
  0x17   : > { %p1273_p12 = por %p101_p8, %p100_p6  ;;  %p1286_p13 = por %p124_p9, %p94_p5 }
  0x18   : > { %s1278_s7 = scalar_select %p85_p10, %s1131_s14, %s87_s29  }
  0x19   : > { %s1281_s8 = scalar_select %p38_p11, %s1139_s16, %s40_s26  }
  0x1a   : > { %s1511_s9 = scalar_select %p1286_p13, 1, 0 }
  0x1b   : > { %p130_p0 = scmp.eq.s32.totalorder %s802_s23, 3  ;;  %p804_p2 = scmp.ge.s32.totalorder %s1159_s21, 4 }
  0x1d   : > { %p1293_p1 = por %p130_p0, %p100_p6  ;;  %149 = sbr.rel (%p804_p2) target bundleno = 82 (0x52), region = 20 }
  0x1f   : > { %s1512_s10 = scalar_select %p1293_p1, 1, 0 }
  0x24   : > { %152 = sbr.rel (!%p1250_p3) target bundleno = 56 (0x38), region = 24  ;;  %s154_s11 = sand.u32 (%p1250_p3), 1, %s1139_s16  }
  0x25   : > { %s841_s22 = sshll.u32 (%p1250_p3), %s1155_s20, 5  ;;  %s805_s26 = sshll.u32 (%p1250_p3), %s154_s11, 6 }
  0x26   : > { %s159_s27 = sadd.s32 (%p1250_p3), %s1151_s19, %s841_s22  ;;  %s1513_s0 = sld [smem:[#allocation12_spill]] (%p1250_p3) }
  0x27   : > { %s808_s29 = sshll.u32 (%p1250_p3), %s159_s27, 2  ;;  %s156_s28 = scalar_lea.vmem (%p1250_p3), [#allocation3], %s805_s26 }
  0x2c   : > { %s1306_s5 = scalar_lea.vmem %s1513_s0, %s808_s29 }
  0x2d   : > { %v177_v0 = vld [vmem:[%s1306_s5] sm:$0xf]  ;;  %v179_v1 = vld [vmem:[%s1306_s5 + $0x8] sm:$0xf]  ;;  %v181_v2 = vld [vmem:[%s1306_s5 + $0x10] sm:$0xf] }
  0x2e   : > { %178 = vst [vmem:[%s156_s28] sm:$0xf] %v177_v0  ;;  %180 = vst [vmem:[%s156_s28 + $0x4] sm:$0xf] %v179_v1  ;;  %v183_v3 = vld [vmem:[%s1306_s5 + $0x18] sm:$0xf] }
  0x2f   : > { %182 = vst [vmem:[%s156_s28 + $0x8] sm:$0xf] %v181_v2  ;;  %v185_v4 = vld [vmem:[%s1306_s5 + $0x20] sm:$0xf]  ;;  %v187_v5 = vld [vmem:[%s1306_s5 + $0x28] sm:$0xf] }
  0x30   : > { %184 = vst [vmem:[%s156_s28 + $0xc] sm:$0xf] %v183_v3  ;;  %186 = vst [vmem:[%s156_s28 + $0x10] sm:$0xf] %v185_v4  ;;  %v189_v6 = vld [vmem:[%s1306_s5 + $0x30] sm:$0xf] }
  0x31   : > { %188 = vst [vmem:[%s156_s28 + $0x14] sm:$0xf] %v187_v5  ;;  %v191_v7 = vld [vmem:[%s1306_s5 + $0x38] sm:$0xf]  ;;  %v193_v8 = vld [vmem:[%s1306_s5 + $0x40] sm:$0xf] }
  0x32   : > { %190 = vst [vmem:[%s156_s28 + $0x18] sm:$0xf] %v189_v6  ;;  %192 = vst [vmem:[%s156_s28 + $0x1c] sm:$0xf] %v191_v7  ;;  %v195_v9 = vld [vmem:[%s1306_s5 + $0x48] sm:$0xf] }
  0x33   : > { %194 = vst [vmem:[%s156_s28 + $0x20] sm:$0xf] %v193_v8  ;;  %v197_v10 = vld [vmem:[%s1306_s5 + $0x50] sm:$0xf]  ;;  %v199_v11 = vld [vmem:[%s1306_s5 + $0x58] sm:$0xf] }
  0x34   : > { %196 = vst [vmem:[%s156_s28 + $0x24] sm:$0xf] %v195_v9  ;;  %198 = vst [vmem:[%s156_s28 + $0x28] sm:$0xf] %v197_v10  ;;  %v201_v12 = vld [vmem:[%s1306_s5 + $0x60] sm:$0xf] }
  0x35   : > { %200 = vst [vmem:[%s156_s28 + $0x2c] sm:$0xf] %v199_v11  ;;  %v203_v13 = vld [vmem:[%s1306_s5 + $0x68] sm:$0xf]  ;;  %v205_v14 = vld [vmem:[%s1306_s5 + $0x70] sm:$0xf] }
  0x36   : > { %202 = vst [vmem:[%s156_s28 + $0x30] sm:$0xf] %v201_v12  ;;  %204 = vst [vmem:[%s156_s28 + $0x34] sm:$0xf] %v203_v13  ;;  %v207_v15 = vld [vmem:[%s1306_s5 + $0x78] sm:$0xf] }
  0x37   : > { %206 = vst [vmem:[%s156_s28 + $0x38] sm:$0xf] %v205_v14  ;;  %208 = vst [vmem:[%s156_s28 + $0x3c] sm:$0xf] %v207_v15 }
  0x38 PF: > { %s264_s11 = sand.u32 1, %s1131_s14   ;;  %s842_s22 = sshll.u32 %s1155_s20, 11 }
  0x39   : > { %s809_s26 = sshll.u32 %s264_s11, 7  ;;  %s1329_s23 = scalar_lea.hbm %s1500_s2, %s842_s22 }
  0x3a   : > { %s268_s4 = scalar_lea.vmem [#allocation4], %s809_s26  ;;  %s1333_s5 = scalar_lea.sflag [#allocation5], %s264_s11 }
  0x3b   : > { %s275_s0 = sshll.u32 %s268_s4, 4  ;;  %s1017_s28 = scalar_lea.hbm %s1329_s23, 2048  ;;  %s1331_s0 = int_to_ptr.vmem [resolvable:$true] %s275_s0 }
  0x3c   : > { %p1018_p3 = scmp.ne.s32.totalorder %s1329_s23, %s1017_s28  ;;  %s1021_s22 = scalar_lea.hbm %s1500_s2, 4096 }
  0x3d   : > { %p1022_p6 = scmp.lt.u32.totalorder %s1329_s23, %s1500_s2  ;;  %p1023_p8 = scmp.lt.u32.totalorder %s1021_s22, %s1017_s28 }
  0x3e   : > { %p1019_p4 = pnand %p1018_p3, %p1264_p7  ;;  %p1025_p10 = scmp.lt.u32.totalorder %s1017_s28, %s1329_s23 }
  0x3f   : > { %p1024_p9 = por %p1023_p8, %p1022_p6 }
  0x40   : > { %p1020_p5 = pneg %p1019_p4 }
  0x41   : > { %p1026_p11 = por %p1025_p10, %p1024_p9 }
  0x43   : > { %p1027_p0 = pnand %p1026_p11, %p1020_p5 }
  0x45   : > { %1030 = shalt.err (!%p1027_p0)
}
  0x46   : > { %s1031_s11 = scalar_lea.vmem %s1331_s0, 2048  ;;  %s1161_s24 = smov [#allocation4]  }
  0x47   : > { %p1032_p2 = scmp.ne.s32.totalorder %s1331_s0, %s1031_s11  ;;  %s1035_s25 = sshll.u32 %s1161_s24, 4  ;;  %s1036_s25 = int_to_ptr.vmem [resolvable:$false] %s1035_s25 }
  0x48   : > { %s1037_s26 = scalar_lea.vmem %s1036_s25, 4096  ;;  %p1038_p1 = scmp.lt.s32.totalorder %s1331_s0, %s1036_s25 }
  0x49   : > { %p1033_p3 = pnand %p1032_p2, %p1264_p7  ;;  %p1039_p13 = scmp.lt.s32.totalorder %s1037_s26, %s1031_s11 }
  0x4b   : > { %p1034_p4 = pneg %p1033_p3  ;;  %p1040_p6 = por %p1039_p13, %p1038_p1 }
  0x4d   : > { %p1041_p8 = pnand %p1040_p6, %p1034_p4 }
  0x4f   : > { %1044 = shalt.err (!%p1041_p8)
}
  0x50   : > { %s1162_s4 = smov 128   ;;  %s1163_s28 = smov 8  }
  0x51   : > { %908 = dma.hbm_to_vmem [thread:$0]  (%p1264_p7), %s1329_s23, 2048, %s1331_s0, %s1333_s5, %s1162_s4, %s1162_s4, %s1163_s28  }
  0x52 PF: > { %p812_p5 = scmp.ge.s32.totalorder %s1159_s21, 1  ;;  %p283_p9 = scmp.lt.s32.totalorder %s1159_s21, 5 }
  0x54   : > { %p284_p10 = pnand %p812_p5, %p283_p9 }
  0x55   : > { %s290_s22 = sand.u32 (!%p284_p10), 1, %s1135_s15   ;;  %s1361_s27 = sand.u32 (!%p284_p10), 1, %s1127_s13  }
  0x56   : > { %287 = sbr.rel (%p284_p10) target bundleno = 402 (0x192), region = 69  ;;  %s813_s29 = sshll.u32 (!%p284_p10), %s290_s22, 6 }
  0x57   : > { %s814_s11 = sshll.u32 (!%p284_p10), %s1361_s27, 7  ;;  %s1364_s24 = scalar_lea.vmem (!%p284_p10), [#allocation3], %s813_s29 }
  0x58   : > { %s297_s0 = scalar_lea.sflag (!%p284_p10), [#allocation5], %s1361_s27  ;;  %s1367_s30 = scalar_lea.vmem (!%p284_p10), [#allocation4], %s814_s11 }
  0x5d   : > { %1114 = dma.done.wait (%p1273_p12), %s297_s0, 2048  }
  0x5e   : > { %1116 = vsyncadd (%p1273_p12), %s297_s0, 4294965248  ;;  %s1373_s23 = scalar_lea.vmem [#allocation7], %s814_s11  ;;  %p816_p7 = scmp.ne.s32.totalorder %s1143_s17, 0 }
  0x5f   : > { %v335_v16 = vld [vmem:[%s1367_s30] sm:$0xff] (!%p816_p7)  ;;  %v336_v17 = vld [vmem:[%s1367_s30 + $0x8] sm:$0xff] (!%p816_p7)  ;;  %v337_v18 = vld [vmem:[%s1367_s30 + $0x10] sm:$0xff] (!%p816_p7) }
  0x60   : > { %334 = sbr.rel (%p816_p7) target bundleno = 104 (0x68), region = 81  ;;  %351 = vst [vmem:[#allocation2] sm:$0xff] (!%p816_p7), %v335_v16  ;;  %352 = vst [vmem:[#allocation2 + $0x8] sm:$0xff] (!%p816_p7), %v336_v17  ;;  %v338_v19 = vld [vmem:[%s1367_s30 + $0x18] sm:$0xff] (!%p816_p7)  ;;  %v339_v20 = vld [vmem:[%s1367_s30 + $0x20] sm:$0xff] (!%p816_p7) }
  0x61   : > { %353 = vst [vmem:[#allocation2 + $0x10] sm:$0xff] (!%p816_p7), %v337_v18  ;;  %v340_v21 = vld [vmem:[%s1367_s30 + $0x28] sm:$0xff] (!%p816_p7)  ;;  %354 = vst [vmem:[#allocation2 + $0x18] sm:$0xff] (!%p816_p7), %v338_v19  ;;  %v341_v22 = vld [vmem:[%s1367_s30 + $0x30] sm:$0xff] (!%p816_p7) }
  0x62   : > { %355 = vst [vmem:[#allocation2 + $0x20] sm:$0xff] (!%p816_p7), %v339_v20  ;;  %356 = vst [vmem:[#allocation2 + $0x28] sm:$0xff] (!%p816_p7), %v340_v21  ;;  %v342_v23 = vld [vmem:[%s1367_s30 + $0x38] sm:$0xff] (!%p816_p7)  ;;  %v343_v24 = vld [vmem:[%s1367_s30 + $0x40] sm:$0xff] (!%p816_p7) }
  0x63   : > { %357 = vst [vmem:[#allocation2 + $0x30] sm:$0xff] (!%p816_p7), %v341_v22  ;;  %358 = vst [vmem:[#allocation2 + $0x38] sm:$0xff] (!%p816_p7), %v342_v23  ;;  %v344_v25 = vld [vmem:[%s1367_s30 + $0x48] sm:$0xff] (!%p816_p7)  ;;  %v345_v26 = vld [vmem:[%s1367_s30 + $0x50] sm:$0xff] (!%p816_p7) }
  0x64   : > { %359 = vst [vmem:[#allocation2 + $0x40] sm:$0xff] (!%p816_p7), %v343_v24  ;;  %v346_v27 = vld [vmem:[%s1367_s30 + $0x58] sm:$0xff] (!%p816_p7)  ;;  %360 = vst [vmem:[#allocation2 + $0x48] sm:$0xff] (!%p816_p7), %v344_v25  ;;  %v347_v28 = vld [vmem:[%s1367_s30 + $0x60] sm:$0xff] (!%p816_p7) }
  0x65   : > { %361 = vst [vmem:[#allocation2 + $0x50] sm:$0xff] (!%p816_p7), %v345_v26  ;;  %362 = vst [vmem:[#allocation2 + $0x58] sm:$0xff] (!%p816_p7), %v346_v27  ;;  %v348_v29 = vld [vmem:[%s1367_s30 + $0x68] sm:$0xff] (!%p816_p7)  ;;  %v349_v30 = vld [vmem:[%s1367_s30 + $0x70] sm:$0xff] (!%p816_p7) }
  0x66   : > { %363 = vst [vmem:[#allocation2 + $0x60] sm:$0xff] (!%p816_p7), %v347_v28  ;;  %364 = vst [vmem:[#allocation2 + $0x68] sm:$0xff] (!%p816_p7), %v348_v29  ;;  %v350_v31 = vld [vmem:[%s1367_s30 + $0x78] sm:$0xff] (!%p816_p7) }
  0x67   : > { %365 = vst [vmem:[#allocation2 + $0x70] sm:$0xff] %v349_v30  ;;  %366 = vst [vmem:[#allocation2 + $0x78] sm:$0xff] %v350_v31 }
  0x68 PF: > { %s817_s15 = sshll.u32 %s1143_s17, 7  ;;  %v1009_v32 = vld [vmem:[%s1364_s24] sm:$0xff]   ;;  %v1011_v42 = vld [vmem:[%s1364_s24 + $0x8] sm:$0xff]   ;;  %v1013_v44 = vld [vmem:[%s1364_s24 + $0x10] sm:$0xff]   ;;  %p835_p12 = scmp.ne.s32.totalorder %s1143_s17, 1 }
  0x69   : > { %s400_s6 = sshra.s32 %s817_s15, 3  ;;  %v1010_v33 = vld [vmem:[%s1364_s24 + $0x20] sm:$0xff]   ;;  %876 = vmatprep.mubr.bf16.mxu0 %v1009_v32  ;;  %v1012_v43 = vld [vmem:[%s1364_s24 + $0x28] sm:$0xff]   ;;  %v1014_v45 = vld [vmem:[%s1364_s24 + $0x30] sm:$0xff]  }
  0x6a   : > { %s818_s5 = sshll.u32 %s400_s6, 2  ;;  %884 = vmatprep.mubr.bf16.mxu1 %v1010_v33  ;;  %v1015_v46 = vld [vmem:[%s1364_s24 + $0x18] sm:$0xff]   ;;  %v370_v48 = vld [vmem:[#allocation2 + $0x10] sm:$0xff]  ;;  %v368_v50 = vld [vmem:[#allocation2] sm:$0xff] }
  0x6b   : > { %s1398_s4 = scalar_lea.vmem %s1499_s1, %s818_s5  ;;  %v1016_v47 = vld [vmem:[%s1364_s24 + $0x38] sm:$0xff]   ;;  %v369_v60 = vld [vmem:[#allocation2 + $0x8] sm:$0xff]  ;;  %v374_v8 = vld [vmem:[#allocation2 + $0x30] sm:$0xff] }
  0x6c   : > { %v1001_v34 = vld [vmem:[%s1398_s4] sm:$0xff]   ;;  %v1002_v35 = vld [vmem:[%s1398_s4 + $0x8] sm:$0xff]   ;;  %v1003_v36 = vld [vmem:[%s1398_s4 + $0x10] sm:$0xff]  }
  0x6d   : > { %860 = vmatprep.subr.bf16.mxu0 %v1001_v34  ;;  %892 = vmatprep.subr.bf16.mxu1 %v1001_v34  ;;  %v1004_v37 = vld [vmem:[%s1398_s4 + $0x18] sm:$0xff]   ;;  %v1005_v38 = vld [vmem:[%s1398_s4 + $0x20] sm:$0xff]   ;;  %v1006_v39 = vld [vmem:[%s1398_s4 + $0x28] sm:$0xff]  }
  0x6e   : > { %861 = vmatpush3.bf16.msra.mxu0 %v1001_v34  ;;  %900 = vmatpush3.bf16.msra.mxu1 %v1001_v34  ;;  %v1007_v40 = vld [vmem:[%s1398_s4 + $0x30] sm:$0xff]   ;;  %v1008_v41 = vld [vmem:[%s1398_s4 + $0x38] sm:$0xff]   ;;  %v376_v51 = vld [vmem:[#allocation2 + $0x40] sm:$0xff] }
  0x6f   : > { %862 = vmatprep.subr.bf16.mxu0 %v1002_v35  ;;  %893 = vmatprep.subr.bf16.mxu1 %v1002_v35  ;;  %v378_v49 = vld [vmem:[#allocation2 + $0x50] sm:$0xff]  ;;  %v371_v54 = vld [vmem:[#allocation2 + $0x18] sm:$0xff]  ;;  %v377_v61 = vld [vmem:[#allocation2 + $0x48] sm:$0xff] }
  0x70   : > { %v379_v55 = vld [vmem:[#allocation2 + $0x58] sm:$0xff]  ;;  %v382_v9 = vld [vmem:[#allocation2 + $0x70] sm:$0xff]  ;;  %v372_v10 = vld [vmem:[#allocation2 + $0x20] sm:$0xff] }
  0x71   : > { %v380_v11 = vld [vmem:[#allocation2 + $0x60] sm:$0xff]  ;;  %v375_v14 = vld [vmem:[#allocation2 + $0x38] sm:$0xff]  ;;  %v373_v20 = vld [vmem:[#allocation2 + $0x28] sm:$0xff] }
  0x72   : > { %863 = vmatpush3.bf16.msra.mxu0 %v1002_v35  ;;  %901 = vmatpush3.bf16.msra.mxu1 %v1002_v35  ;;  %v383_v15 = vld [vmem:[#allocation2 + $0x78] sm:$0xff]  ;;  %v381_v21 = vld [vmem:[#allocation2 + $0x68] sm:$0xff] }
  0x73   : > { %864 = vmatprep.subr.bf16.mxu0 %v1003_v36  ;;  %894 = vmatprep.subr.bf16.mxu1 %v1003_v36 }
  0x76   : > { %865 = vmatpush3.bf16.msra.mxu0 %v1003_v36  ;;  %902 = vmatpush3.bf16.msra.mxu1 %v1003_v36 }
  0x77   : > { %866 = vmatprep.subr.bf16.mxu0 %v1004_v37  ;;  %895 = vmatprep.subr.bf16.mxu1 %v1004_v37 }
  0x7a   : > { %867 = vmatpush3.bf16.msra.mxu0 %v1004_v37  ;;  %903 = vmatpush3.bf16.msra.mxu1 %v1004_v37 }
  0x7b   : > { %868 = vmatprep.subr.bf16.mxu0 %v1005_v38  ;;  %896 = vmatprep.subr.bf16.mxu1 %v1005_v38 }
  0x7e   : > { %869 = vmatpush3.bf16.msra.mxu0 %v1005_v38  ;;  %904 = vmatpush3.bf16.msra.mxu1 %v1005_v38 }
  0x7f   : > { %870 = vmatprep.subr.bf16.mxu0 %v1006_v39  ;;  %897 = vmatprep.subr.bf16.mxu1 %v1006_v39 }
  0x82   : > { %871 = vmatpush3.bf16.msra.mxu0 %v1006_v39  ;;  %905 = vmatpush3.bf16.msra.mxu1 %v1006_v39 }
  0x83   : > { %872 = vmatprep.subr.bf16.mxu0 %v1007_v40  ;;  %898 = vmatprep.subr.bf16.mxu1 %v1007_v40 }
  0x86   : > { %873 = vmatpush3.bf16.msra.mxu0 %v1007_v40  ;;  %906 = vmatpush3.bf16.msra.mxu1 %v1007_v40 }
  0x87   : > { %874 = vmatprep.subr.bf16.mxu0 %v1008_v41  ;;  %899 = vmatprep.subr.bf16.mxu1 %v1008_v41 }
  0x8a   : > { %875 = vmatpush3.bf16.msra.mxu0 %v1008_v41  ;;  %907 = vmatpush3.bf16.msra.mxu1 %v1008_v41 }
  0x8d   : > { %877 = vmatmul.mubr.bf16.vlgmr.msra.gmra.mrb[0].mxu0 %v1011_v42  ;;  %885 = vmatmul.mubr.bf16.vlgmr.msra.gmra.mrb[0].mxu1 %v1012_v43 }
  0x8e   : > { %880 = vmatprep.mubr.bf16.mxu0 %v1013_v44  ;;  %888 = vmatprep.mubr.bf16.mxu1 %v1014_v45 }
  0x95   : > { %881 = vmatmul.mubr.bf16.gmra.mrb[4].mxu0 %v1015_v46  ;;  %889 = vmatmul.mubr.bf16.gmra.mrb[4].mxu1 %v1016_v47 }
 0x160   : > { %v878_v52 = vpop.f32.mrb[0].mxu0  ;;  %v886_v53 = vpop.f32.mrb[0].mxu1 }
 0x161   : > { %v615_v56 = vadd.f32 %v878_v52, %v370_v48  ;;  %v623_v57 = vadd.f32 %v886_v53, %v378_v49  ;;  %v550_v58 = vpop.f32.mrb[1].mxu0  ;;  %v582_v59 = vpop.f32.mrb[1].mxu1 }
 0x162   : > { %v613_v62 = vadd.f32 %v550_v58, %v368_v50  ;;  %v621_v63 = vadd.f32 %v582_v59, %v376_v51  ;;  %v879_v0 = vpop.f32.mrb[2].mxu0  ;;  %v887_v1 = vpop.f32.mrb[2].mxu1 }
 0x163   : > { %631 = vst [vmem:[#allocation2 + $0x10] sm:$0xff] %v615_v56  ;;  %639 = vst [vmem:[#allocation2 + $0x50] sm:$0xff] %v623_v57  ;;  %v616_v2 = vadd.f32 %v879_v0, %v371_v54  ;;  %v624_v3 = vadd.f32 %v887_v1, %v379_v55  ;;  %v553_v4 = vpop.f32.mrb[3].mxu0  ;;  %v585_v5 = vpop.f32.mrb[3].mxu1 }
 0x164   : > { %629 = vst [vmem:[#allocation2] sm:$0xff] %v613_v62  ;;  %637 = vst [vmem:[#allocation2 + $0x40] sm:$0xff] %v621_v63  ;;  %v614_v6 = vadd.f32 %v553_v4, %v369_v60  ;;  %v622_v7 = vadd.f32 %v585_v5, %v377_v61 }
 0x165   : > { %632 = vst [vmem:[#allocation2 + $0x18] sm:$0xff] %v616_v2  ;;  %640 = vst [vmem:[#allocation2 + $0x58] sm:$0xff] %v624_v3 }
 0x166   : > { %630 = vst [vmem:[#allocation2 + $0x8] sm:$0xff] %v614_v6  ;;  %638 = vst [vmem:[#allocation2 + $0x48] sm:$0xff] %v622_v7 }
 0x168   : > { %v882_v12 = vpop.f32.mrb[4].mxu0  ;;  %v890_v13 = vpop.f32.mrb[4].mxu1  ;;  %648 = sbr.rel (%p835_p12) target bundleno = 376 (0x178), region = 85 }
 0x169   : > { %v619_v16 = vadd.f32 %v882_v12, %v374_v8  ;;  %v627_v17 = vadd.f32 %v890_v13, %v382_v9  ;;  %v566_v18 = vpop.f32.mrb[5].mxu0  ;;  %v598_v19 = vpop.f32.mrb[5].mxu1 }
 0x16a   : > { %v617_v22 = vadd.f32 %v566_v18, %v372_v10  ;;  %v625_v23 = vadd.f32 %v598_v19, %v380_v11  ;;  %v883_v24 = vpop.f32.mrb[6].mxu0  ;;  %v891_v25 = vpop.f32.mrb[6].mxu1  ;;  %v651_v34 = vld [vmem:[#allocation2 + $0x10] sm:$0xff] (!%p835_p12) }
 0x16b   : > { %635 = vst [vmem:[#allocation2 + $0x30] sm:$0xff] %v619_v16  ;;  %643 = vst [vmem:[#allocation2 + $0x70] sm:$0xff] %v627_v17  ;;  %v620_v26 = vadd.f32 %v883_v24, %v375_v14  ;;  %v628_v27 = vadd.f32 %v891_v25, %v383_v15  ;;  %v569_v28 = vpop.f32.mrb[7].mxu0  ;;  %v601_v29 = vpop.f32.mrb[7].mxu1  ;;  %v649_v32 = vld [vmem:[#allocation2] sm:$0xff] (!%p835_p12)  ;;  %v659_v42 = vld [vmem:[#allocation2 + $0x50] sm:$0xff] (!%p835_p12) }
 0x16c   : > { %633 = vst [vmem:[#allocation2 + $0x20] sm:$0xff] %v617_v22  ;;  %641 = vst [vmem:[#allocation2 + $0x60] sm:$0xff] %v625_v23  ;;  %v618_v30 = vadd.f32 %v569_v28, %v373_v20  ;;  %v626_v31 = vadd.f32 %v601_v29, %v381_v21  ;;  %v652_v35 = vld [vmem:[#allocation2 + $0x18] sm:$0xff] (!%p835_p12)  ;;  %v657_v40 = vld [vmem:[#allocation2 + $0x40] sm:$0xff] (!%p835_p12) }
 0x16d   : > { %636 = vst [vmem:[#allocation2 + $0x38] sm:$0xff] %v620_v26  ;;  %644 = vst [vmem:[#allocation2 + $0x78] sm:$0xff] %v628_v27  ;;  %v650_v33 = vld [vmem:[#allocation2 + $0x8] sm:$0xff] (!%p835_p12)  ;;  %v660_v43 = vld [vmem:[#allocation2 + $0x58] sm:$0xff] (!%p835_p12) }
 0x16e   : > { %634 = vst [vmem:[#allocation2 + $0x28] sm:$0xff] %v618_v30  ;;  %642 = vst [vmem:[#allocation2 + $0x68] sm:$0xff] %v626_v31  ;;  %v658_v41 = vld [vmem:[#allocation2 + $0x48] sm:$0xff] (!%p835_p12) }
 0x16f   : > { %665 = vst [vmem:[%s1373_s23] sm:$0xff] %v649_v32  ;;  %666 = vst [vmem:[%s1373_s23 + $0x8] sm:$0xff] %v650_v33 }
 0x170   : > { %667 = vst [vmem:[%s1373_s23 + $0x10] sm:$0xff] %v651_v34  ;;  %668 = vst [vmem:[%s1373_s23 + $0x18] sm:$0xff] %v652_v35 }
 0x171   : > { %673 = vst [vmem:[%s1373_s23 + $0x40] sm:$0xff] %v657_v40  ;;  %674 = vst [vmem:[%s1373_s23 + $0x48] sm:$0xff] %v658_v41 }
 0x172   : > { %v655_v38 = vld [vmem:[#allocation2 + $0x30] sm:$0xff]  ;;  %675 = vst [vmem:[%s1373_s23 + $0x50] sm:$0xff] %v659_v42  ;;  %676 = vst [vmem:[%s1373_s23 + $0x58] sm:$0xff] %v660_v43 }
 0x173   : > { %v653_v36 = vld [vmem:[#allocation2 + $0x20] sm:$0xff]  ;;  %671 = vst [vmem:[%s1373_s23 + $0x30] sm:$0xff] %v655_v38  ;;  %v663_v46 = vld [vmem:[#allocation2 + $0x70] sm:$0xff] }
 0x174   : > { %669 = vst [vmem:[%s1373_s23 + $0x20] sm:$0xff] %v653_v36  ;;  %v656_v39 = vld [vmem:[#allocation2 + $0x38] sm:$0xff]  ;;  %v661_v44 = vld [vmem:[#allocation2 + $0x60] sm:$0xff]  ;;  %679 = vst [vmem:[%s1373_s23 + $0x70] sm:$0xff] %v663_v46 }
 0x175   : > { %v654_v37 = vld [vmem:[#allocation2 + $0x28] sm:$0xff]  ;;  %672 = vst [vmem:[%s1373_s23 + $0x38] sm:$0xff] %v656_v39  ;;  %677 = vst [vmem:[%s1373_s23 + $0x60] sm:$0xff] %v661_v44  ;;  %v664_v47 = vld [vmem:[#allocation2 + $0x78] sm:$0xff] }
 0x176   : > { %670 = vst [vmem:[%s1373_s23 + $0x28] sm:$0xff] %v654_v37  ;;  %v662_v45 = vld [vmem:[#allocation2 + $0x68] sm:$0xff]  ;;  %680 = vst [vmem:[%s1373_s23 + $0x78] sm:$0xff] %v664_v47 }
 0x177   : > { %678 = vst [vmem:[%s1373_s23 + $0x68] sm:$0xff] %v662_v45 }
 0x178 PF: > { %s843_s17 = sshll.u32 %s1147_s18, 11  ;;  %s695_s11 = sshll.u32 %s1373_s23, 4  ;;  %s1438_s11 = int_to_ptr.vmem [resolvable:$true] %s695_s11 }
 0x179   : > { %s1435_s29 = scalar_lea.hbm %s1501_s3, %s843_s17  ;;  %s682_s24 = scalar_lea.sflag [#allocation6], %s1361_s27 }
 0x17a   : > { %s1045_s0 = scalar_lea.vmem %s1438_s11, 2048  ;;  %p1514_p1 = scmp.ne.s32.totalorder %s1511_s9, 0 }
 0x17b   : > { %p1046_p13 = scmp.ne.s32.totalorder %s1438_s11, %s1045_s0  ;;  %s1164_s30 = smov [#allocation7]  }
 0x17c   : > { %s1049_s15 = sshll.u32 %s1164_s30, 4  ;;  %s1050_s15 = int_to_ptr.vmem [resolvable:$false] %s1049_s15 }
 0x17d   : > { %p1047_p11 = pnand %p1046_p13, %p1514_p1  ;;  %s1051_s18 = scalar_lea.vmem %s1050_s15, 4096 }
 0x17e   : > { %p1052_p2 = scmp.lt.s32.totalorder %s1438_s11, %s1050_s15  ;;  %p1053_p3 = scmp.lt.s32.totalorder %s1051_s18, %s1045_s0 }
 0x17f   : > { %p1048_p0 = pneg %p1047_p11 }
 0x180   : > { %p1054_p4 = por %p1053_p3, %p1052_p2 }
 0x182   : > { %p1055_p6 = pnand %p1054_p4, %p1048_p0 }
 0x184   : > { %1058 = shalt.err (!%p1055_p6)
}
 0x185   : > { %s1059_s23 = scalar_lea.hbm %s1435_s29, 2048  ;;  %s1063_s25 = scalar_lea.hbm %s1501_s3, 4096 }
 0x186   : > { %p1060_p8 = scmp.ne.s32.totalorder %s1435_s29, %s1059_s23  ;;  %p1064_p10 = scmp.lt.u32.totalorder %s1435_s29, %s1501_s3 }
 0x187   : > { %p1065_p7 = scmp.lt.u32.totalorder %s1063_s25, %s1059_s23  ;;  %p1067_p13 = scmp.lt.u32.totalorder %s1059_s23, %s1435_s29 }
 0x188   : > { %p1061_p5 = pnand %p1060_p8, %p1514_p1 }
 0x189   : > { %p1066_p12 = por %p1065_p7, %p1064_p10 }
 0x18a   : > { %p1062_p9 = pneg %p1061_p5 }
 0x18b   : > { %p1068_p11 = por %p1067_p13, %p1066_p12 }
 0x18d   : > { %p1069_p0 = pnand %p1068_p11, %p1062_p9 }
 0x18f   : > { %1072 = shalt.err (!%p1069_p0)
}
 0x190   : > { %s1165_s17 = smov 128   ;;  %s1166_s28 = smov 8  }
 0x191   : > { %910 = dma.vmem_to_hbm [thread:$0]  (%p1514_p1), %s1438_s11, 2048, %s1435_s29, %s682_s24, %s1165_s17, %s1165_s17, %s1166_s28  }
 0x192 PF: > { %p916_p2 = scmp.ge.s32.totalorder %s1159_s21, 2  ;;  %s710_s22 = sand.u32 1, %s1123_s12  }
 0x193   : > { %p1515_p3 = scmp.ne.s32.totalorder %s1512_s10, 0  ;;  %s711_s0 = scalar_lea.sflag [#allocation6], %s710_s22 }
 0x195   : > { %p913_p4 = pnand %p916_p2, %p1515_p3 }
 0x197   : > { %1118 = dma.done.wait (!%p913_p4), %s711_s0, 2048  }
 0x198   : > { %1120 = vsyncadd (!%p913_p4), %s711_s0, 4294965248  ;;  %s19_s21 = sadd.s32 1, %s1159_s21   ;;  %s1516_s9 = sld [smem:[#allocation10_spill]] }
 0x199   : > { %p16_p6 = scmp.ge.s32.totalorder %s19_s21, 6   ;;  %s1517_s27 = sld [smem:[#allocation11_spill]] }
 0x19a   : > { %s1518_s12 = smov %s1127_s13  ;;  %s1519_s13 = smov %s1131_s14 }
 0x19b   : > { %s1520_s14 = smov %s1278_s7  ;;  %s1521_s15 = smov %s1139_s16 }
 0x19c   : > { %s1522_s16 = smov %s1281_s8  ;;  %s1523_s17 = smov %s1151_s19 }
 0x19d   : > { %s1524_s18 = smov %s1155_s20  ;;  %18 = sbr.rel (!%p16_p6) target bundleno = 10 (0xa), region = 135 }
 0x19e   : > { %s1525_s19 = smov %s1516_s9 }
 0x19f   : > { %s1526_s20 = smov %s1517_s27 }
 0x1a4   :  { %716 = vsyncpa [#allocation5], 1 }
 0x1a5   :  { %718 = vsyncpa [#allocation5 + $0x1], 1 }
 0x1a6   :  { %719 = vsyncpa [#allocation6], 1 }
 0x1a7   :  { %721 = vsyncpa [#allocation6 + $0x1], 1 }

</bundles_post_ra>
